<compile_context>
chip_gen: v6e
topology: v6e:2x2x1
jax: 0.10.0
libtpu: 0.0.40
codegen_flags: <defaults>
</compile_context>

<pallas_src>
import math

import jax
import jax.numpy as jnp
import numpy as np
from jax.experimental import pallas as pl
from jax.experimental.pallas import tpu as pltpu


# --------------------------------------------------------------------------
# Parameter construction (mimics kaiming_normal_(fan_in, leaky_relu))
# --------------------------------------------------------------------------
def init_token_conv_weight(key, c_in, d_model):
    """Conv1d weight in PyTorch layout (d_model, c_in, 3)."""
    fan_in = c_in * 3
    gain = math.sqrt(2.0 / (1.0 + 0.01 ** 2))
    std = gain / math.sqrt(fan_in)
    return std * jax.random.normal(key, (d_model, c_in, 3), dtype=jnp.float32)


# --------------------------------------------------------------------------
# Pallas kernel: fused 3-tap circular conv == one (tile_n, 3C) @ (3C, D) matmul
# --------------------------------------------------------------------------
def _token_conv_kernel(xcat_ref, w_ref, o_ref):
    # xcat_ref: (tile_n, 3*c_in)  circular 3-tap im2col rows
    # w_ref:    (3*c_in, D)       fused conv weight (tap-major rows)
    # o_ref:    (tile_n, D)       output slab (f32 or bf16)
    acc = jnp.dot(xcat_ref[...], w_ref[...], preferred_element_type=jnp.float32)
    o_ref[...] = acc.astype(o_ref.dtype)


def _round_up(x, m):
    return ((x + m - 1) // m) * m


def _choose_row_tile(N, desired):
    """Pick a row tile tn (multiple of 8) <= desired.

    Prefers (a) a divisor of N so no row padding / no post-kernel slice copy,
    and (b) a grid of >= 2 steps so both v7x TensorCores are used.
    Returns (tn, n_pad)."""
    desired = max(8, (int(desired) // 8) * 8)
    if N % 8 == 0:
        cap = min(desired, N)
        # First pass: divisors that give >= 2 grid steps.
        if N >= 16:
            start = min(cap, (N // 2 // 8) * 8)
            for tn in range((start // 8) * 8, 7, -8):
                if tn > 0 and N % tn == 0:
                    return tn, N
        # Second pass: any multiple-of-8 divisor (may give a single step).
        for tn in range((cap // 8) * 8, 7, -8):
            if tn > 0 and N % tn == 0:
                return tn, N
    # Fallback: pad the row count up to a multiple of tn.
    tn = max(8, min(desired, _round_up(N, 8)))
    n_pad = pl.cdiv(N, tn) * tn
    return tn, n_pad


def token_embedding(x, weight, *, tile_n=1024, out_dtype=jnp.float32):
    """x: [B, L, c_in] float; weight: [d_model, c_in, 3] (PyTorch Conv1d layout).

    Returns [B, L, d_model] in `out_dtype`, matching TokenEmbedding.forward.
    """
    B, L, C = x.shape
    D = weight.shape[0]
    x = x.astype(jnp.float32)

    # Circular 3-tap im2col along the sequence axis:
    #   out[l] = W[:,:,0]·x[(l-1)%L] + W[:,:,1]·x[l] + W[:,:,2]·x[(l+1)%L]
    x_prev = jnp.roll(x, 1, axis=1)
    x_next = jnp.roll(x, -1, axis=1)
    xcat = jnp.concatenate([x_prev, x, x_next], axis=-1)            # (B, L, 3C)

    N = B * L
    C3 = 3 * C
    xcat = xcat.reshape(N, C3)

    # Fused weight: row k*C + c holds W[:, c, k]  ->  shape (3C, D).
    w = jnp.transpose(weight, (2, 1, 0)).reshape(C3, D).astype(jnp.float32)

    out_itemsize = jnp.dtype(out_dtype).itemsize

    # --- VMEM budget (double-buffered in/out blocks, lane-padded in VMEM) ----
    budget = 40 << 20                         # safe even on v7x (64 MiB VMEM)
    per_row = 2 * (_round_up(C3, 128) * 4 + _round_up(D, 128) * out_itemsize)
    w_bytes = 2 * _round_up(C3, 8) * _round_up(D, 128) * 4
    max_tn = max(8, ((budget - w_bytes) // per_row // 8) * 8)
    desired = max(8, min(int(tile_n), max_tn))

    tn, n_pad = _choose_row_tile(N, desired)
    if n_pad != N:
        xcat = jnp.pad(xcat, ((0, n_pad - N), (0, 0)))

    cost = pl.CostEstimate(
        flops=2 * N * C3 * D,
        transcendentals=0,
        bytes_accessed=n_pad * C3 * 4 + C3 * D * 4 + n_pad * D * out_itemsize)

    out = pl.pallas_call(
        _token_conv_kernel,
        out_shape=jax.ShapeDtypeStruct((n_pad, D), out_dtype),
        grid=(n_pad // tn,),
        in_specs=[
            pl.BlockSpec((tn, C3), lambda i: (i, 0)),
            pl.BlockSpec((C3, D), lambda i: (0, 0)),   # grid-invariant weight
        ],
        out_specs=pl.BlockSpec((tn, D), lambda i: (i, 0)),
        compiler_params=pltpu.CompilerParams(
            dimension_semantics=("parallel",),
            vmem_limit_bytes=48 << 20),
        cost_estimate=cost,
    )(xcat, w)

    if n_pad != N:
        out = out[:N]
    return out.reshape(B, L, D)


# --------------------------------------------------------------------------
# Independent reference (explicit circular pad + cross-correlation, like PyTorch)
# --------------------------------------------------------------------------
def token_embedding_ref(x, weight):
    xc = jnp.transpose(x.astype(jnp.float32), (0, 2, 1))              # (B, C, L)
    xc = jnp.concatenate([xc[:, :, -1:], xc, xc[:, :, :1]], axis=-1)  # circular pad 1
    y = jax.lax.conv_general_dilated(
        xc, weight.astype(jnp.float32), window_strides=(1,), padding="VALID",
        dimension_numbers=("NCH", "OIH", "NCH"),
        precision=jax.lax.Precision.HIGHEST)
    return jnp.transpose(y, (0, 2, 1))                                # (B, L, D)


if __name__ == "__main__":
    B, L, c_in, d_model = 2, 16, 4, 32

    key = jax.random.PRNGKey(0)
    kx, kw = jax.random.split(key)
    x = jax.random.normal(kx, (B, L, c_in), dtype=jnp.float32)
    weight = init_token_conv_weight(kw, c_in, d_model)

    ref = token_embedding_ref(x, weight)

    # f32 output path (default).
    out = jax.block_until_ready(token_embedding(x, weight))
    np.testing.assert_allclose(np.asarray(out), np.asarray(ref),
                               atol=1e-4, rtol=1e-4)
    assert out.shape == (B, L, d_model) and out.dtype == jnp.float32

    # bf16 output path (f32 MXU accumulation, cast on store).
    out_bf16 = jax.block_until_ready(
        token_embedding(x, weight, out_dtype=jnp.bfloat16))
    assert out_bf16.shape == (B, L, d_model) and out_bf16.dtype == jnp.bfloat16
    np.testing.assert_allclose(np.asarray(out_bf16, dtype=np.float32),
                               np.asarray(ref), atol=5e-2, rtol=5e-2)

    print("KERNEL_OK")
</pallas_src>

<mosaic_0001>
module attributes {stable_mosaic.version = 11 : i64} {
  func.func @_token_conv_kernel(%arg0: i32, %arg1: memref<16x12xf32, #tpu.memory_space<vmem>>, %arg2: memref<12x32xf32, #tpu.memory_space<vmem>>, %arg3: memref<16x32xf32, #tpu.memory_space<vmem>>) attributes {dimension_semantics = [#tpu.dimension_semantics<parallel>], iteration_bounds = array<i64: 2>, scalar_prefetch = 0 : i64, scratch_operands = 0 : i64, tpu.core_type = #tpu.core_type<tc>, window_params = [{transform_indices = @transform_0, window_bounds = array<i64: 16, 12>}, {pipeline_mode = #tpu.pipeline_mode<synchronous>, transform_indices = @transform_1, window_bounds = array<i64: 12, 32>}, {transform_indices = @transform_2, window_bounds = array<i64: 16, 32>}]} {
    %c0 = arith.constant 0 : index
    %c0_0 = arith.constant 0 : index
    %0 = vector.load %arg1[%c0, %c0_0] : memref<16x12xf32, #tpu.memory_space<vmem>>, vector<16x12xf32>
    %c0_1 = arith.constant 0 : index
    %c0_2 = arith.constant 0 : index
    %1 = vector.load %arg2[%c0_1, %c0_2] : memref<12x32xf32, #tpu.memory_space<vmem>>, vector<12x32xf32>
    %cst = arith.constant dense<0.000000e+00> : vector<16x32xf32>
    %2 = tpu.matmul %0, %1, %cst {dimension_numbers = #tpu.dot_dimension_numbers<[1], [0], [0], [1], [0, 0, 1, 1], [], []>} : vector<16x12xf32>, vector<12x32xf32>, vector<16x32xf32> -> vector<16x32xf32>
    %c0_3 = arith.constant 0 : index
    %c0_4 = arith.constant 0 : index
    %3 = vector.load %arg3[%c0_3, %c0_4] : memref<16x32xf32, #tpu.memory_space<vmem>>, vector<16x32xf32>
    tpu.vector_store %arg3[%c0_3, %c0_4], %2 {strides = array<i32>} : memref<16x32xf32, #tpu.memory_space<vmem>>, vector<16x32xf32>,
    return
  }
  func.func @transform_0(%arg0: i32) -> (i32, i32) {
    %c0_i32 = arith.constant 0 : i32
    %c0_i32_0 = arith.constant 0 : i32
    return %arg0, %c0_i32 : i32, i32
  }
  func.func @transform_1(%arg0: i32) -> (i32, i32) {
    %c0_i32 = arith.constant 0 : i32
    %c0_i32_0 = arith.constant 0 : i32
    %c0_i32_1 = arith.constant 0 : i32
    return %c0_i32, %c0_i32_0 : i32, i32
  }
  func.func @transform_2(%arg0: i32) -> (i32, i32) {
    %c0_i32 = arith.constant 0 : i32
    %c0_i32_0 = arith.constant 0 : i32
    return %arg0, %c0_i32 : i32, i32
  }
}

</mosaic_0001>

<bundles_post_ra>
// kernel: tpu_custom_call.1
= control target key start
LH: loop header
LB: loop body
LE: loop exit
PB: predicated region body
PF: predicated region fallthrough
CT: control target
= control target key end

     0   :  { %7 = vsyncpa [#allocation3], 0  ;;  %s569_s0 = inlined_call_operand.vmem [shape: f32[32,12], index: 0, kind: input, shape index: {}]   ;;  %s570_s1 = inlined_call_operand.vmem [shape: f32[12,32], index: 1, kind: input, shape index: {}]   ;;  %s571_s2 = inlined_call_operand.hbm [shape: f32[32,32], index: 2, kind: output, shape index: {}]  }
   0x1   :  { %9 = vsyncpa [#allocation3 + $0x1], 0  ;;  %s462_s9 = smov 0   ;;  %s464_s10 = smov 0  }
   0x2   :  { %s466_s11 = smov 0   ;;  %s468_s12 = smov 0  }
   0x3 LB: > { %s483_s13 = sadd.s32 4294967295, %s442_s12   ;;  %s314_s14 = sadd.s32 4294967294, %s442_s12   ;;  %s442_s12 = sphi %s468_s12, %s577_s12   ;;  %s438_s11 = sphi %s466_s11, %s576_s11   ;;  %s434_s10 = sphi %s464_s10, %s575_s10   ;;  %s430_s9 = sphi %s462_s9, %s574_s9  }
   0x4   : > { %s487_s15 = sadd.s32 1, %s442_s12   ;;  %s69_s16 = sadd.s32 1, %s438_s11 }
   0x5   : > { %s66_s17 = ssub.s32 %s442_s12, %s487_s15  ;;  %p79_p0 = scmp.ne.s32.totalorder %s438_s11, %s434_s10 }
   0x6   : > { %p67_p1 = scmp.eq.s32.totalorder %s66_s17, 0  ;;  %p80_p2 = scmp.eq.s32.totalorder %s483_s13, 1 }
   0x7   : > { %p85_p3 = scmp.ne.s32.totalorder %s434_s10, %s430_s9  ;;  %p86_p4 = scmp.eq.s32.totalorder %s314_s14, 1 }
   0x8   : > { %s498_s18 = scalar_select %p67_p1, %s438_s11, %s69_s16  }
   0x9   : > { %p500_p5 = por %p80_p2, %p79_p0  ;;  %p504_p6 = por %p86_p4, %p85_p3 }
   0xa   : > { %p317_p7 = scmp.ge.s32.totalorder %s442_s12, 1  ;;  %p116_p8 = scmp.lt.s32.totalorder %s442_s12, 3 }
   0xc   : > { %p117_p9 = pnand %p317_p7, %p116_p8 }
   0xd   : > { %s319_s25 = sshll.u32 (!%p117_p9), %s483_s13, 1  ;;  %s135_s30 = sand.u32 (!%p117_p9), 1, %s434_s10  }
   0xe   : > { %120 = sbr.rel (%p117_p9) target bundleno = 233 (0xe9), region = 28  ;;  %p139_p10 = scmp.lt.s32.totalorder (!%p117_p9), %s319_s25, 3 }
   0xf   : > { %s318_s3 = sshll.u32 (!%p117_p9), %s135_s30, 4  ;;  %s329_s6 = sshll.u32 (!%p117_p9), %s483_s13, 8 }
  0x10   : > { %s137_s4 = scalar_lea.vmem (!%p117_p9), [#allocation2], %s318_s3  ;;  %s527_s14 = scalar_lea.hbm (!%p117_p9), %s571_s2, %s329_s6 }
  0x11   : > { %s252_s5 = sshll.u32 (!%p117_p9), %s137_s4, 4  ;;  %s529_s16 = scalar_lea.sflag (!%p117_p9), [#allocation3], %s135_s30  ;;  %s522_s5 = int_to_ptr.vmem [resolvable:$true] %s252_s5 }
  0x12   : > { %s382_s17 = scalar_lea.vmem (!%p117_p9), %s522_s5, 256  ;;  %s444_s13 = smov (!%p117_p9), [#allocation2]  }
  0x13   : > { %v148_v0 = vld [vmem:[%s570_s1 + $0x8] sm:$0xf]  ;;  %vm156_vm0 = vcmask 1043456   ;;  %v147_v1 = vld [vmem:[%s570_s1] sm:$0xff]  ;;  %s579_s25 = smov (!%p139_p10, %s319_s25), 3  ;;  %vm149_vm1 = vcmask 97280   ;;  %p383_p11 = scmp.ne.s32.totalorder %s522_s5, %s382_s17 }
  0x14   : > { %334 = vmatprep.subr.msk.mxu0 %vm156_vm0, %v148_v0  ;;  %s320_s26 = sshll.u32 %s579_s25, 3  ;;  %vm235_vm2 = vcmask 261120   ;;  %s386_s21 = sshll.u32 %s444_s13, 4  ;;  %s387_s21 = int_to_ptr.vmem [resolvable:$false] %s386_s21 }
  0x15   : > { %335 = vmatpush3.msk.msra.mxu0 %vm156_vm0, %v148_v0  ;;  %s142_s29 = scalar_lea.vmem %s569_s0, %s320_s26  ;;  %p384_p12 = pnand %p383_p11, %p500_p5 }
  0x16   : > { %336 = vmatprep.subr.mxu0 %v147_v1  ;;  %v145_v2 = vld [vmem:[%s142_s29] sm:$0xff]  ;;  %v146_v3 = vld [vmem:[%s142_s29 + $0x8] sm:$0xff]  ;;  %s388_s22 = scalar_lea.vmem %s387_s21, 512  ;;  %p389_p0 = scmp.lt.s32.totalorder %s522_s5, %s387_s21 }
  0x17   : > { %337 = vmatpush3.msra.mxu0 %v147_v1  ;;  %338 = vmatprep.mubr.msk.f32.mxu0 %vm149_vm1, %v145_v2  ;;  %p385_p13 = pneg %p384_p12  ;;  %p390_p1 = scmp.lt.s32.totalorder %s388_s22, %s382_s17 }
  0x18   : > { %339 = vmatmul.mubr.msk.f32.vlgmr.msra.gmra.mxu0 %vm149_vm1, %v146_v3 }
  0x19   : > { %p391_p2 = por %p390_p1, %p389_p0 }
  0x1b   : > { %p392_p3 = pnand %p391_p2, %p385_p13 }
  0xd8   : > { %v340_v4 = vpop.f32.mrf.mxu0 }
  0xd9   : > { %237 = vst.msk [vmem:[%s137_s4 + $0x8] sm:$0xff] %vm235_vm2, %v340_v4 }
  0xda   : > { %v226_v5 = vpop.f32.mrf.mxu0 }
  0xdb   : > { %236 = vst.msk [vmem:[%s137_s4] sm:$0xff] %vm235_vm2, %v226_v5 }
  0xdc   : > { %395 = shalt.err (!%p392_p3)
}
  0xdd   : > { %s396_s23 = scalar_lea.hbm %s527_s14, 256  ;;  %s400_s26 = scalar_lea.hbm %s571_s2, 512 }
  0xde   : > { %p397_p4 = scmp.ne.s32.totalorder %s527_s14, %s396_s23  ;;  %p401_p9 = scmp.lt.s32.totalorder %s527_s14, %s571_s2 }
  0xdf   : > { %p402_p10 = scmp.lt.s32.totalorder %s400_s26, %s396_s23 }
  0xe0   : > { %p398_p7 = pnand %p397_p4, %p500_p5 }
  0xe1   : > { %p403_p11 = por %p402_p10, %p401_p9 }
  0xe2   : > { %p399_p8 = pneg %p398_p7 }
  0xe4   : > { %p404_p12 = pnand %p403_p11, %p399_p8 }
  0xe6   : > { %407 = shalt.err (!%p404_p12)
}
  0xe7   : > { %s445_s29 = smov 128   ;;  %s446_s30 = smov 8  }
  0xe8   : > { %341 = dma.vmem_to_hbm [thread:$0]  (%p500_p5), %s522_s5, 256, %s527_s14, %s529_s16, %s445_s29, %s445_s29, %s446_s30  }
  0xe9 PF: > { %p347_p13 = scmp.ge.s32.totalorder %s442_s12, 2  ;;  %s267_s3 = sand.u32 1, %s430_s9  }
  0xea   : > { %s268_s4 = scalar_lea.sflag [#allocation3], %s267_s3 }
  0xeb   : > { %p344_p0 = pnand %p347_p13, %p504_p6 }
  0xed   : > { %p345_p1 = pneg %p344_p0 }
  0xef   : > { %425 = dma.done.wait (%p345_p1), %s268_s4, 256  }
  0xf0   : > { %427 = vsyncadd (%p345_p1), %s268_s4, 4294967040  ;;  %p12_p2 = scmp.ge.s32.totalorder %s487_s15, 4   ;;  %s574_s9 = smov %s434_s10 }
  0xf1   : > { %s575_s10 = smov %s438_s11  ;;  %s576_s11 = smov %s498_s18 }
  0xf2   : > { %s577_s12 = smov %s487_s15  ;;  %14 = sbr.rel (!%p12_p2) target bundleno = 3 (0x3), region = 63 }
  0xf7   :  { %273 = vsyncpa [#allocation3], 1 }
  0xf8   :  { %275 = vsyncpa [#allocation3 + $0x1], 1 }

</bundles_post_ra>
